<compile_context>
chip_gen: v7x
topology: tpu7x:2x2x1
jax: 0.10.0
libtpu: 0.0.40
codegen_flags: <defaults>
</compile_context>

<pallas_src>
import jax
import jax.numpy as jnp
from jax.experimental import pallas as pl
from jax.experimental.pallas import tpu as pltpu

STATE_DIM = 8
ACTION_DIM = 1
HIDDEN_DIM = 128
ACTION_BOUND = 3.0

_DEFAULT_TILE = 2048  # batch columns per grid step (multiple of 128)


def _round_up(n, m):
    return ((n + m - 1) // m) * m


def _policy_kernel(x_ref, w1_ref, b1_ref, w2_ref, b2_ref, wh_ref, bh_ref, out_ref):
    # x_ref: [STATE_DIM, T]   (batch on lanes)
    x = x_ref[...]

    # fc1 + relu : [128, 8] @ [8, T] -> [128, T]
    h1 = jnp.dot(w1_ref[...], x, preferred_element_type=jnp.float32) + b1_ref[...]
    h1 = jnp.maximum(h1, 0.0)

    # fc2 + relu : [64, 128] @ [128, T] -> [64, T]
    h2 = jnp.dot(w2_ref[...], h1, preferred_element_type=jnp.float32) + b2_ref[...]
    h2 = jnp.maximum(h2, 0.0)

    # fused mu/std head : [2, 64] @ [64, T] -> [2, T]
    head = jnp.dot(wh_ref[...], h2, preferred_element_type=jnp.float32) + bh_ref[...]

    # row 0 -> mu = action_bound * tanh(.)
    # row 1 -> std = softplus(.) + 1e-10   (numerically stable softplus)
    mu_full = ACTION_BOUND * jnp.tanh(head)
    softplus = jnp.maximum(head, 0.0) + jnp.log1p(jnp.exp(-jnp.abs(head)))
    std_full = softplus + 1e-10

    row = jax.lax.broadcasted_iota(jnp.int32, head.shape, 0)
    out_ref[...] = jnp.where(row == 0, mu_full, std_full)


def policy_network_forward(x, params, *, tile=_DEFAULT_TILE):
    """x: [B, STATE_DIM] float32. Returns (mu, std), each [B, ACTION_DIM]."""
    B = x.shape[0]
    w1, b1, w2, b2, wh, bh = params

    # Batch tile: multiple of 128 (lane width), capped at `tile`, no bigger
    # than needed for small B.
    t = min(_round_up(tile, 128), _round_up(max(B, 1), 128))
    B_pad = _round_up(B, t)
    grid = (B_pad // t,)

    # Feature-major input: [STATE_DIM, B_pad], zero-padded batch columns.
    # Padded columns only ever influence themselves (column-local math) and
    # are sliced away below.
    x_t = jnp.pad(x.astype(jnp.float32).T, ((0, 0), (0, B_pad - B)))

    out = pl.pallas_call(
        _policy_kernel,
        out_shape=jax.ShapeDtypeStruct((2, B_pad), jnp.float32),
        grid=grid,
        in_specs=[
            pl.BlockSpec((STATE_DIM, t), lambda i: (0, i)),      # x tile
            pl.BlockSpec(w1.shape, lambda i: (0, 0)),            # resident weights
            pl.BlockSpec(b1.shape, lambda i: (0, 0)),
            pl.BlockSpec(w2.shape, lambda i: (0, 0)),
            pl.BlockSpec(b2.shape, lambda i: (0, 0)),
            pl.BlockSpec(wh.shape, lambda i: (0, 0)),
            pl.BlockSpec(bh.shape, lambda i: (0, 0)),
        ],
        out_specs=pl.BlockSpec((2, t), lambda i: (0, i)),        # lane-dense output
        compiler_params=pltpu.CompilerParams(
            dimension_semantics=("parallel",)),
    )(x_t, w1, b1, w2, b2, wh, bh)

    mu = out[0, :B].reshape(B, ACTION_DIM)
    std = out[1, :B].reshape(B, ACTION_DIM)
    return mu, std


def init_params(key):
    """Deterministic init mimicking PyTorch's default Linear init:
    U(-1/sqrt(fan_in), 1/sqrt(fan_in)).  Weights stored [out, in],
    biases [out, 1].  The mu and std heads are fused into one [2, 64] layer
    (row 0 = fc_mu, row 1 = fc_std)."""
    dims = [
        (STATE_DIM, HIDDEN_DIM),             # fc1
        (HIDDEN_DIM, HIDDEN_DIM // 2),       # fc2
        (HIDDEN_DIM // 2, 2 * ACTION_DIM),   # fc_mu + fc_std fused
    ]
    params = []
    for (fan_in, fan_out) in dims:
        key, kw, kb = jax.random.split(key, 3)
        bound = 1.0 / jnp.sqrt(float(fan_in))
        w = jax.random.uniform(kw, (fan_out, fan_in), jnp.float32, -bound, bound)
        b = jax.random.uniform(kb, (fan_out, 1), jnp.float32, -bound, bound)
        params.extend([w, b])
    return tuple(params)


def reference_forward(x, params):
    """Plain-JAX reference matching the PyTorch module."""
    w1, b1, w2, b2, wh, bh = params
    h1 = jax.nn.relu(x @ w1.T + b1[:, 0])
    h2 = jax.nn.relu(h1 @ w2.T + b2[:, 0])
    head = h2 @ wh.T + bh[:, 0]
    mu = ACTION_BOUND * jnp.tanh(head[:, 0:ACTION_DIM])
    std = jax.nn.softplus(head[:, ACTION_DIM:2 * ACTION_DIM]) + 1e-10
    return mu, std


def _check(batch, key, params):
    kx = jax.random.fold_in(key, batch)
    x = jax.random.normal(kx, (batch, STATE_DIM), jnp.float32)
    mu, std = policy_network_forward(x, params)
    jax.block_until_ready((mu, std))
    mu_ref, std_ref = reference_forward(x, params)
    assert mu.shape == (batch, ACTION_DIM) and std.shape == (batch, ACTION_DIM)
    assert jnp.allclose(mu, mu_ref, atol=1e-5, rtol=1e-5)
    assert jnp.allclose(std, std_ref, atol=1e-5, rtol=1e-5)
    assert bool(jnp.all(std > 0.0))


if __name__ == "__main__":
    key = jax.random.PRNGKey(0)
    key, kparam = jax.random.split(key)
    params = init_params(kparam)

    # Small smoke test (matches typical PPO per-step usage) ...
    _check(8, key, params)
    # ... and a multi-tile, non-128-multiple batch to exercise padding,
    # grid > 1, and resident-weight reuse across grid steps.
    _check(3000, key, params)

    print("KERNEL_OK")
</pallas_src>

<mosaic_0001>
module attributes {stable_mosaic.version = 11 : i64} {
  func.func @_policy_kernel(%arg0: i32, %arg1: memref<8x128xf32, #tpu.memory_space<vmem>>, %arg2: memref<128x8xf32, #tpu.memory_space<vmem>>, %arg3: memref<128x1xf32, #tpu.memory_space<vmem>>, %arg4: memref<64x128xf32, #tpu.memory_space<vmem>>, %arg5: memref<64x1xf32, #tpu.memory_space<vmem>>, %arg6: memref<2x64xf32, #tpu.memory_space<vmem>>, %arg7: memref<2x1xf32, #tpu.memory_space<vmem>>, %arg8: memref<2x128xf32, #tpu.memory_space<vmem>>) attributes {dimension_semantics = [#tpu.dimension_semantics<parallel>], iteration_bounds = array<i64: 1>, scalar_prefetch = 0 : i64, scratch_operands = 0 : i64, tpu.core_type = #tpu.core_type<tc>, window_params = [{transform_indices = @transform_0, window_bounds = array<i64: 8, 128>}, {pipeline_mode = #tpu.pipeline_mode<synchronous>, transform_indices = @transform_1, window_bounds = array<i64: 128, 8>}, {pipeline_mode = #tpu.pipeline_mode<synchronous>, transform_indices = @transform_2, window_bounds = array<i64: 128, 1>}, {pipeline_mode = #tpu.pipeline_mode<synchronous>, transform_indices = @transform_3, window_bounds = array<i64: 64, 128>}, {pipeline_mode = #tpu.pipeline_mode<synchronous>, transform_indices = @transform_4, window_bounds = array<i64: 64, 1>}, {pipeline_mode = #tpu.pipeline_mode<synchronous>, transform_indices = @transform_5, window_bounds = array<i64: 2, 64>}, {pipeline_mode = #tpu.pipeline_mode<synchronous>, transform_indices = @transform_6, window_bounds = array<i64: 2, 1>}, {transform_indices = @transform_7, window_bounds = array<i64: 2, 128>}]} {
    %c0 = arith.constant 0 : index
    %c0_0 = arith.constant 0 : index
    %0 = vector.load %arg1[%c0, %c0_0] : memref<8x128xf32, #tpu.memory_space<vmem>>, vector<8x128xf32>
    %c0_1 = arith.constant 0 : index
    %c0_2 = arith.constant 0 : index
    %1 = vector.load %arg2[%c0_1, %c0_2] : memref<128x8xf32, #tpu.memory_space<vmem>>, vector<128x8xf32>
    %cst = arith.constant dense<0.000000e+00> : vector<128x128xf32>
    %2 = tpu.matmul %1, %0, %cst {dimension_numbers = #tpu.dot_dimension_numbers<[1], [0], [0], [1], [0, 0, 1, 1], [], []>} : vector<128x8xf32>, vector<8x128xf32>, vector<128x128xf32> -> vector<128x128xf32>
    %c0_3 = arith.constant 0 : index
    %c0_4 = arith.constant 0 : index
    %3 = vector.load %arg3[%c0_3, %c0_4] : memref<128x1xf32, #tpu.memory_space<vmem>>, vector<128x1xf32>
    %4 = vector.broadcast %3 : vector<128x1xf32> to vector<128x128xf32>
    %5 = arith.addf %2, %4 : vector<128x128xf32>
    %cst_5 = arith.constant 0.000000e+00 : f32
    %6 = vector.broadcast %cst_5 : f32 to vector<128x128xf32>
    %7 = arith.maximumf %5, %6 : vector<128x128xf32>
    %c0_6 = arith.constant 0 : index
    %c0_7 = arith.constant 0 : index
    %8 = vector.load %arg4[%c0_6, %c0_7] : memref<64x128xf32, #tpu.memory_space<vmem>>, vector<64x128xf32>
    %cst_8 = arith.constant dense<0.000000e+00> : vector<64x128xf32>
    %9 = tpu.matmul %8, %7, %cst_8 {dimension_numbers = #tpu.dot_dimension_numbers<[1], [0], [0], [1], [0, 0, 1, 1], [], []>} : vector<64x128xf32>, vector<128x128xf32>, vector<64x128xf32> -> vector<64x128xf32>
    %c0_9 = arith.constant 0 : index
    %c0_10 = arith.constant 0 : index
    %10 = vector.load %arg5[%c0_9, %c0_10] : memref<64x1xf32, #tpu.memory_space<vmem>>, vector<64x1xf32>
    %11 = vector.broadcast %10 : vector<64x1xf32> to vector<64x128xf32>
    %12 = arith.addf %9, %11 : vector<64x128xf32>
    %cst_11 = arith.constant 0.000000e+00 : f32
    %13 = vector.broadcast %cst_11 : f32 to vector<64x128xf32>
    %14 = arith.maximumf %12, %13 : vector<64x128xf32>
    %c0_12 = arith.constant 0 : index
    %c0_13 = arith.constant 0 : index
    %15 = vector.load %arg6[%c0_12, %c0_13] : memref<2x64xf32, #tpu.memory_space<vmem>>, vector<2x64xf32>
    %cst_14 = arith.constant dense<0.000000e+00> : vector<2x128xf32>
    %16 = tpu.matmul %15, %14, %cst_14 {dimension_numbers = #tpu.dot_dimension_numbers<[1], [0], [0], [1], [0, 0, 1, 1], [], []>} : vector<2x64xf32>, vector<64x128xf32>, vector<2x128xf32> -> vector<2x128xf32>
    %c0_15 = arith.constant 0 : index
    %c0_16 = arith.constant 0 : index
    %17 = vector.load %arg7[%c0_15, %c0_16] : memref<2x1xf32, #tpu.memory_space<vmem>>, vector<2x1xf32>
    %18 = vector.broadcast %17 : vector<2x1xf32> to vector<2x128xf32>
    %19 = arith.addf %16, %18 : vector<2x128xf32>
    %20 = math.tanh %19 : vector<2x128xf32>
    %cst_17 = arith.constant 3.000000e+00 : f32
    %21 = vector.broadcast %cst_17 : f32 to vector<2x128xf32>
    %22 = arith.mulf %21, %20 : vector<2x128xf32>
    %cst_18 = arith.constant 0.000000e+00 : f32
    %23 = vector.broadcast %cst_18 : f32 to vector<2x128xf32>
    %24 = arith.maximumf %19, %23 : vector<2x128xf32>
    %25 = math.absf %19 : vector<2x128xf32>
    %cst_19 = arith.constant 0.000000e+00 : f32
    %26 = vector.broadcast %cst_19 : f32 to vector<2x128xf32>
    %27 = arith.subf %26, %25 : vector<2x128xf32>
    %28 = math.exp %27 : vector<2x128xf32>
    %29 = math.log1p %28 : vector<2x128xf32>
    %30 = arith.addf %24, %29 : vector<2x128xf32>
    %cst_20 = arith.constant 1.000000e-10 : f32
    %31 = vector.broadcast %cst_20 : f32 to vector<2x128xf32>
    %32 = arith.addf %30, %31 : vector<2x128xf32>
    %33 = tpu.iota {dimensions = array<i32: 0>} : vector<2x128xi32>
    %c0_i32 = arith.constant 0 : i32
    %34 = vector.broadcast %c0_i32 : i32 to vector<2x128xi32>
    %35 = arith.cmpi eq, %33, %34 : vector<2x128xi32>
    %36 = arith.select %35, %22, %32 : vector<2x128xi1>, vector<2x128xf32>
    %c0_21 = arith.constant 0 : index
    %c0_22 = arith.constant 0 : index
    %37 = vector.load %arg8[%c0_21, %c0_22] : memref<2x128xf32, #tpu.memory_space<vmem>>, vector<2x128xf32>
    tpu.vector_store %arg8[%c0_21, %c0_22], %36 {strides = array<i32>} : memref<2x128xf32, #tpu.memory_space<vmem>>, vector<2x128xf32>,
    return
  }
  func.func @transform_0(%arg0: i32) -> (i32, i32) {
    %c0_i32 = arith.constant 0 : i32
    %c0_i32_0 = arith.constant 0 : i32
    return %c0_i32, %arg0 : i32, i32
  }
  func.func @transform_1(%arg0: i32) -> (i32, i32) {
    %c0_i32 = arith.constant 0 : i32
    %c0_i32_0 = arith.constant 0 : i32
    %c0_i32_1 = arith.constant 0 : i32
    return %c0_i32, %c0_i32_0 : i32, i32
  }
  func.func @transform_2(%arg0: i32) -> (i32, i32) {
    %c0_i32 = arith.constant 0 : i32
    %c0_i32_0 = arith.constant 0 : i32
    %c0_i32_1 = arith.constant 0 : i32
    return %c0_i32, %c0_i32_0 : i32, i32
  }
  func.func @transform_3(%arg0: i32) -> (i32, i32) {
    %c0_i32 = arith.constant 0 : i32
    %c0_i32_0 = arith.constant 0 : i32
    %c0_i32_1 = arith.constant 0 : i32
    return %c0_i32, %c0_i32_0 : i32, i32
  }
  func.func @transform_4(%arg0: i32) -> (i32, i32) {
    %c0_i32 = arith.constant 0 : i32
    %c0_i32_0 = arith.constant 0 : i32
    %c0_i32_1 = arith.constant 0 : i32
    return %c0_i32, %c0_i32_0 : i32, i32
  }
  func.func @transform_5(%arg0: i32) -> (i32, i32) {
    %c0_i32 = arith.constant 0 : i32
    %c0_i32_0 = arith.constant 0 : i32
    %c0_i32_1 = arith.constant 0 : i32
    return %c0_i32, %c0_i32_0 : i32, i32
  }
  func.func @transform_6(%arg0: i32) -> (i32, i32) {
    %c0_i32 = arith.constant 0 : i32
    %c0_i32_0 = arith.constant 0 : i32
    %c0_i32_1 = arith.constant 0 : i32
    return %c0_i32, %c0_i32_0 : i32, i32
  }
  func.func @transform_7(%arg0: i32) -> (i32, i32) {
    %c0_i32 = arith.constant 0 : i32
    %c0_i32_0 = arith.constant 0 : i32
    return %c0_i32, %arg0 : i32, i32
  }
}

</mosaic_0001>

<bundles_post_ra>
// kernel: tpu_custom_call.1
= control target key start
LH: loop header
LB: loop body
LE: loop exit
PB: predicated region body
PF: predicated region fallthrough
CT: control target
= control target key end

     0   :  { %vm140_vm0 = vcmask 64512   ;;  %v874_v4 = vmov 0   ;;  %s1100_s0 = inlined_call_operand.vmem [shape: f32[8,128], index: 0, kind: input, shape index: {}]   ;;  %s1101_s1 = inlined_call_operand.vmem [shape: f32[128,8], index: 1, kind: input, shape index: {}]   ;;  %s1102_s2 = inlined_call_operand.vmem [shape: f32[128,1], index: 2, kind: input, shape index: {}]   ;;  %s1103_s3 = inlined_call_operand.vmem [shape: f32[64,128], index: 3, kind: input, shape index: {}]   ;;  %s1104_s4 = inlined_call_operand.vmem [shape: f32[64,1], index: 4, kind: input, shape index: {}]   ;;  %s1105_s5 = inlined_call_operand.vmem [shape: f32[2,64], index: 5, kind: input, shape index: {}]   ;;  %s1106_s6 = inlined_call_operand.vmem [shape: f32[2,1], index: 6, kind: input, shape index: {}]   ;;  %s1107_s7 = inlined_call_operand.hbm [shape: f32[2,128], index: 7, kind: output, shape index: {}]  }
   0x1   :  { %v27_v0 = vld [vmem:[%s1100_s0] sm:$0xff]  ;;  %v29_v2 = vld [vmem:[%s1101_s1 + $0x8] sm:$0xff]  ;;  %v30_v3 = vld [vmem:[%s1101_s1 + $0x10] sm:$0xff]  ;;  %842 = vset.pattern.permute.xlu0 %v874_v4  ;;  %843 = vset.pattern.permute.xlu1 %v874_v4 }
   0x2   :  { %v28_v1 = vld [vmem:[%s1101_s1] sm:$0xff]  ;;  %704 = vmatprep.subr.mxu0 %v27_v0  ;;  %v31_v5 = vld [vmem:[%s1101_s1 + $0x18] sm:$0xff]  ;;  %v46_v8 = vld [vmem:[%s1102_s2 + $0x10] sm:$0xff] }
   0x3   :  { %706 = vmatprep.mubr.msk.f32.mxu0 %vm140_vm0, %v28_v1  ;;  %705 = vmatpush3.msra.mxu0 %v27_v0  ;;  %v32_v6 = vld [vmem:[%s1101_s1 + $0x20] sm:$0xff]  ;;  %v45_v9 = vld [vmem:[%s1102_s2 + $0x8] sm:$0xff]  ;;  %v47_v11 = vld [vmem:[%s1102_s2 + $0x18] sm:$0xff] }
   0x4   :  { %707 = vmatmul.mubr.msk.f32.vlgmr.msra.gmra.mrb[0].mxu0 %vm140_vm0, %v29_v2  ;;  %v44_v7 = vld [vmem:[%s1102_s2] sm:$0xff]  ;;  %72 = vperm.xlu1 %843, %v46_v8   ;;  %v33_v10 = vld [vmem:[%s1101_s1 + $0x28] sm:$0xff]  ;;  %v34_v12 = vld [vmem:[%s1101_s1 + $0x30] sm:$0xff] }
   0x5   :  { %709 = vmatprep.mubr.msk.f32.mxu0 %vm140_vm0, %v30_v3  ;;  %62 = vperm.xlu0 %842, %v44_v7   ;;  %v48_v13 = vld [vmem:[%s1102_s2 + $0x20] sm:$0xff]  ;;  %v35_v14 = vld [vmem:[%s1101_s1 + $0x38] sm:$0xff]  ;;  %v49_v15 = vld [vmem:[%s1102_s2 + $0x28] sm:$0xff] }
   0x6   :  { %v36_v16 = vld [vmem:[%s1101_s1 + $0x40] sm:$0xff] }
   0x8   :  { %710 = vmatmul.mubr.msk.f32.gmra.mrb[2].mxu0 %vm140_vm0, %v31_v5  ;;  %77 = vperm.xlu1 %843, %v47_v11  }
   0x9   :  { %712 = vmatprep.mubr.msk.f32.mxu0 %vm140_vm0, %v32_v6  ;;  %67 = vperm.xlu0 %842, %v45_v9  }
   0xc   :  { %713 = vmatmul.mubr.msk.f32.gmra.mrb[4].mxu0 %vm140_vm0, %v33_v10 }
   0xd   :  { %715 = vmatprep.mubr.msk.f32.mxu0 %vm140_vm0, %v34_v12  ;;  %82 = vperm.xlu0 %842, %v48_v13  }
   0xe   :  { %12 = vsyncpa [#allocation3], 0  ;;  %v50_v17 = vld [vmem:[%s1102_s2 + $0x30] sm:$0xff]  ;;  %87 = vperm.xlu1 %843, %v49_v15   ;;  %v37_v18 = vld [vmem:[%s1101_s1 + $0x48] sm:$0xff]  ;;  %vm876_vm1 = vmmov 0   ;;  %vm526_vm2 = vcmask 523264  }
   0xf   :  { %v51_v19 = vld [vmem:[%s1102_s2 + $0x38] sm:$0xff]  ;;  %v38_v20 = vld [vmem:[%s1101_s1 + $0x50] sm:$0xff]  ;;  %v52_v21 = vld [vmem:[%s1102_s2 + $0x40] sm:$0xff] }
  0x10   :  { %716 = vmatmul.mubr.msk.f32.gmra.mrb[6].mxu0 %vm140_vm0, %v35_v14  ;;  %v39_v22 = vld [vmem:[%s1101_s1 + $0x58] sm:$0xff]  ;;  %v53_v23 = vld [vmem:[%s1102_s2 + $0x48] sm:$0xff]  ;;  %v40_v24 = vld [vmem:[%s1101_s1 + $0x60] sm:$0xff] }
  0x11   :  { %718 = vmatprep.mubr.msk.f32.mxu0 %vm140_vm0, %v36_v16  ;;  %92 = vperm.xlu0 %842, %v50_v17   ;;  %v54_v25 = vld [vmem:[%s1102_s2 + $0x50] sm:$0xff]  ;;  %v41_v26 = vld [vmem:[%s1101_s1 + $0x68] sm:$0xff]  ;;  %v55_v27 = vld [vmem:[%s1102_s2 + $0x58] sm:$0xff] }
  0x12   :  { %97 = vperm.xlu1 %843, %v51_v19   ;;  %v42_v28 = vld [vmem:[%s1101_s1 + $0x70] sm:$0xff]  ;;  %v56_v29 = vld [vmem:[%s1102_s2 + $0x60] sm:$0xff]  ;;  %v43_v30 = vld [vmem:[%s1101_s1 + $0x78] sm:$0xff] }
  0x13   :  { %v57_v31 = vld [vmem:[%s1102_s2 + $0x68] sm:$0xff]  ;;  %v58_v32 = vld [vmem:[%s1102_s2 + $0x70] sm:$0xff]  ;;  %v59_v33 = vld [vmem:[%s1102_s2 + $0x78] sm:$0xff] }
  0x14   :  { %719 = vmatmul.mubr.msk.f32.gmra.mrb[8].mxu0 %vm140_vm0, %v37_v18  ;;  %v358_v34 = vld [vmem:[%s1104_s4] sm:$0xff]  ;;  %v359_v35 = vld [vmem:[%s1104_s4 + $0x8] sm:$0xff]  ;;  %v360_v36 = vld [vmem:[%s1104_s4 + $0x10] sm:$0xff] }
  0x15   :  { %721 = vmatprep.mubr.msk.f32.mxu0 %vm140_vm0, %v38_v20  ;;  %102 = vperm.xlu0 %842, %v52_v21   ;;  %v361_v37 = vld [vmem:[%s1104_s4 + $0x18] sm:$0xff]  ;;  %v362_v38 = vld [vmem:[%s1104_s4 + $0x20] sm:$0xff]  ;;  %v363_v39 = vld [vmem:[%s1104_s4 + $0x28] sm:$0xff] }
  0x16   :  { %107 = vperm.xlu1 %843, %v53_v23   ;;  %v364_v40 = vld [vmem:[%s1104_s4 + $0x30] sm:$0xff]  ;;  %v365_v41 = vld [vmem:[%s1104_s4 + $0x38] sm:$0xff]  ;;  %v520_v42 = vld [vmem:[%s1106_s6] sm:$0x3] }
  0x17   :  { %v350_v43 = vld [vmem:[%s1103_s3] sm:$0xff] }
  0x18   :  { %722 = vmatmul.mubr.msk.f32.gmra.mrb[10].mxu0 %vm140_vm0, %v39_v22  ;;  %762 = vmatprep.mubr.f32.mxu1 %v350_v43 }
  0x19   :  { %724 = vmatprep.mubr.msk.f32.mxu0 %vm140_vm0, %v40_v24  ;;  %112 = vperm.xlu0 %842, %v54_v25  }
  0x1a   :  { %117 = vperm.xlu1 %843, %v55_v27  }
  0x1c   :  { %725 = vmatmul.mubr.msk.f32.gmra.mrb[12].mxu0 %vm140_vm0, %v41_v26 }
  0x1d   :  { %727 = vmatprep.mubr.msk.f32.mxu0 %vm140_vm0, %v42_v28  ;;  %122 = vperm.xlu0 %842, %v56_v29  }
  0x1e   :  { %127 = vperm.xlu1 %843, %v57_v31  }
  0x20   :  { %728 = vmatmul.mubr.msk.f32.gmra.mrb[14].mxu0 %vm140_vm0, %v43_v30 }
  0x21   :  { %132 = vperm.xlu0 %842, %v58_v32  }
  0x22   :  { %137 = vperm.xlu1 %843, %v59_v33  }
  0x25   :  { %368 = vperm.xlu0 %842, %v358_v34  }
  0x26   :  { %373 = vperm.xlu1 %843, %v359_v35  }
  0x29   :  { %378 = vperm.xlu0 %842, %v360_v36  }
  0x2a   :  { %383 = vperm.xlu1 %843, %v361_v37  }
  0x2d   :  { %388 = vperm.xlu0 %842, %v362_v38  }
  0x2e   :  { %393 = vperm.xlu1 %843, %v363_v39  }
  0x31   :  { %398 = vperm.xlu0 %842, %v364_v40  }
  0x32   :  { %403 = vperm.xlu1 %843, %v365_v41  }
  0x35   :  { %523 = vperm.xlu0 %842, %v520_v42  }
  0x83   :  { %v73_v44 = vpop.permute.xlu1 %72 }
  0x84   :  { %v63_v45 = vpop.permute.xlu0 %62 }
  0x87   :  { %v78_v46 = vpop.permute.xlu1 %77 }
  0x88   :  { %v68_v47 = vpop.permute.xlu0 %67 }
  0x8c   :  { %v83_v49 = vpop.permute.xlu0 %82 }
  0x8d   :  { %v88_v48 = vpop.permute.xlu1 %87 }
  0x90   :  { %v93_v58 = vpop.permute.xlu0 %92 }
  0x91   :  { %v98_v55 = vpop.permute.xlu1 %97 }
  0x94   :  { %v103_v7 = vpop.permute.xlu0 %102 }
  0x95   :  { %v108_v4 = vpop.permute.xlu1 %107 }
  0x98   :  { %v113_v19 = vpop.permute.xlu0 %112 }
  0x99   :  { %v118_v16 = vpop.permute.xlu1 %117 }
  0x9c   :  { %v123_v32 = vpop.permute.xlu0 %122 }
  0x9d   :  { %v128_v29 = vpop.permute.xlu1 %127 }
  0xa1   :  { %v138_v41 = vpop.permute.xlu1 %137 }
  0xd7   :  { %v708_v50 = vpop.f32.mrb[0].mxu0 }
  0xd8   :  { %v261_v51 = vadd.f32 %v708_v50, %v68_v47  ;;  %v255_v52 = vpop.f32.mrb[1].mxu0 }
  0xd9   :  { %v256_v53 = vadd.f32 %v255_v52, %v63_v45  ;;  %v351_v52 = vld [vmem:[%s1103_s3 + $0x8] sm:$0xff] }
  0xda   :  { %v335_v54 = vmax.f32 %v261_v51, 0.0 }
  0xdb   :  { %v334_v56 = vmax.f32 %v256_v53, 0.0  ;;  %v711_v57 = vpop.f32.mrb[2].mxu0  ;;  %v352_v53 = vld [vmem:[%s1103_s3 + $0x10] sm:$0xff] }
  0xdc   :  { %v271_v59 = vadd.f32 %v711_v57, %v78_v46  ;;  %v265_v60 = vpop.f32.mrb[3].mxu0  ;;  %v356_v57 = vld [vmem:[%s1103_s3 + $0x30] sm:$0xff] }
  0xdd   :  { %v266_v61 = vadd.f32 %v265_v60, %v73_v44  ;;  %v793_v62 = vpack.c.bf16 %v335_v54, %v334_v56  ;;  %v133_v44 = vpop.permute.xlu0 %132  ;;  %v353_v54 = vld [vmem:[%s1103_s3 + $0x18] sm:$0xff]  ;;  %v355_v56 = vld [vmem:[%s1103_s3 + $0x28] sm:$0xff]  ;;  %v877_v60 = vmov 0.0  }
  0xde   :  { %v337_v63 = vmax.f32 %v271_v59, 0.0  ;;  %v875_v59 = vmov 0.0|0.0   ;;  %790 = vmatprep.mubr.msk.f32.mxu0 %vm876_vm1, %v877_v60 }
  0xdf   :  { %v336_v0 = vmax.f32 %v266_v61, 0.0  ;;  %v714_v1 = vpop.f32.mrb[4].mxu0  ;;  %794 = vmatprep.subr.bf16.mxu1 %v793_v62  ;;  %825 = vmatprep.subr.bf16.mxu0 %v875_v59  ;;  %v374_v61 = vpop.permute.xlu1 %373 }
  0xe0   :  { %v281_v2 = vadd.f32 %v714_v1, %v88_v48  ;;  %v275_v3 = vpop.f32.mrb[5].mxu0  ;;  %796 = vmatpush3.bf16.msra.mxu1 %v793_v62 }
  0xe1   :  { %v797_v5 = vpack.c.bf16 %v337_v63, %v336_v0  ;;  %v276_v6 = vadd.f32 %v275_v3, %v83_v49  ;;  %v369_v62 = vpop.permute.xlu0 %368 }
  0xe2   :  { %v339_v8 = vmax.f32 %v281_v2, 0.0 }
  0xe3   :  { %v338_v9 = vmax.f32 %v276_v6, 0.0  ;;  %v717_v10 = vpop.f32.mrb[6].mxu0  ;;  %798 = vmatprep.subr.bf16.mxu1 %v797_v5  ;;  %v384_v63 = vpop.permute.xlu1 %383 }
  0xe4   :  { %v291_v11 = vadd.f32 %v717_v10, %v98_v55  ;;  %v285_v12 = vpop.f32.mrb[7].mxu0  ;;  %800 = vmatpush3.bf16.msra.mxu1 %v797_v5  ;;  %v354_v55 = vld [vmem:[%s1103_s3 + $0x20] sm:$0xff] }
  0xe5   :  { %v801_v13 = vpack.c.bf16 %v339_v8, %v338_v9  ;;  %v286_v14 = vadd.f32 %v285_v12, %v93_v58  ;;  %v357_v58 = vld [vmem:[%s1103_s3 + $0x38] sm:$0xff]  ;;  %v379_v1 = vpop.permute.xlu0 %378 }
  0xe6   :  { %v341_v15 = vmax.f32 %v291_v11, 0.0 }
  0xe7   :  { %v340_v17 = vmax.f32 %v286_v14, 0.0  ;;  %v720_v18 = vpop.f32.mrb[8].mxu0  ;;  %802 = vmatprep.subr.bf16.mxu1 %v801_v13  ;;  %v394_v10 = vpop.permute.xlu1 %393 }
  0xe8   :  { %v301_v20 = vadd.f32 %v720_v18, %v108_v4  ;;  %v295_v21 = vpop.f32.mrb[9].mxu0  ;;  %804 = vmatpush3.bf16.msra.mxu1 %v801_v13 }
  0xe9   :  { %v805_v22 = vpack.c.bf16 %v341_v15, %v340_v17  ;;  %v296_v23 = vadd.f32 %v295_v21, %v103_v7  ;;  %v389_v13 = vpop.permute.xlu0 %388 }
  0xea   :  { %v343_v24 = vmax.f32 %v301_v20, 0.0 }
  0xeb   :  { %v342_v25 = vmax.f32 %v296_v23, 0.0  ;;  %v723_v26 = vpop.f32.mrb[10].mxu0  ;;  %806 = vmatprep.subr.bf16.mxu1 %v805_v22 }
  0xec   :  { %v311_v27 = vadd.f32 %v723_v26, %v118_v16  ;;  %v305_v28 = vpop.f32.mrb[11].mxu0  ;;  %808 = vmatpush3.bf16.msra.mxu1 %v805_v22  ;;  %v404_v22 = vpop.permute.xlu1 %403 }
  0xed   :  { %v809_v30 = vpack.c.bf16 %v343_v24, %v342_v25  ;;  %v306_v31 = vadd.f32 %v305_v28, %v113_v19  ;;  %v399_v25 = vpop.permute.xlu0 %398 }
  0xee   :  { %v345_v33 = vmax.f32 %v311_v27, 0.0 }
  0xef   :  { %v344_v34 = vmax.f32 %v306_v31, 0.0  ;;  %v726_v35 = vpop.f32.mrb[12].mxu0  ;;  %810 = vmatprep.subr.bf16.mxu1 %v809_v30 }
  0xf0   :  { %v321_v36 = vadd.f32 %v726_v35, %v128_v29  ;;  %v315_v37 = vpop.f32.mrb[13].mxu0  ;;  %812 = vmatpush3.bf16.msra.mxu1 %v809_v30 }
  0xf1   :  { %v813_v38 = vpack.c.bf16 %v345_v33, %v344_v34  ;;  %v316_v39 = vadd.f32 %v315_v37, %v123_v32  ;;  %v519_v33 = vld [vmem:[%s1105_s5] sm:$0x3]  ;;  %v524_v34 = vpop.permute.xlu0 %523  ;;  %s878_s5 = smov [#allocation2]  }
  0xf2   :  { %v347_v40 = vmax.f32 %v321_v36, 0.0  ;;  %s629_s24 = sshll.u32 %s878_s5, 4  ;;  %s630_s24 = int_to_ptr.vmem [resolvable:$true] %s629_s24 }
  0xf3   :  { %v346_v42 = vmax.f32 %v316_v39, 0.0  ;;  %v729_v43 = vpop.f32.mrb[14].mxu0  ;;  %814 = vmatprep.subr.bf16.mxu1 %v813_v38  ;;  %s850_s2 = scalar_lea.vmem %s630_s24, 32  ;;  %p855_p1 = scmp.lt.s32.totalorder %s630_s24, %s630_s24 }
  0xf4   :  { %v331_v45 = vadd.f32 %v729_v43, %v138_v41  ;;  %v325_v46 = vpop.f32.mrb[15].mxu0  ;;  %816 = vmatpush3.bf16.msra.mxu1 %v813_v38  ;;  %p851_p0 = scmp.ne.s32.totalorder %s630_s24, %s850_s2  ;;  %p856_p2 = scmp.lt.s32.totalorder %s850_s2, %s850_s2 }
  0xf5   :  { %v817_v47 = vpack.c.bf16 %v347_v40, %v346_v42  ;;  %v326_v48 = vadd.f32 %v325_v46, %v133_v44 }
  0xf6   :  { %v349_v49 = vmax.f32 %v331_v45, 0.0  ;;  %v618_v45 = vlaneseq  ;;  %p857_p3 = por %p856_p2, %p855_p1 }
  0xf7   :  { %v348_v50 = vmax.f32 %v326_v48, 0.0  ;;  %818 = vmatprep.subr.bf16.mxu1 %v817_v47 }
  0xf8   :  { %820 = vmatpush3.bf16.msra.mxu1 %v817_v47  ;;  %p858_p4 = pnand %p857_p3, %p851_p0 }
  0xf9   :  { %v821_v51 = vpack.c.bf16 %v349_v49, %v348_v50  ;;  %v619_v50 = vshrl.u32 %v618_v45, 7 }
  0xfb   :  { %822 = vmatprep.subr.bf16.mxu1 %v821_v51  ;;  %vm620_vm4 = vcmp.eq.s32.totalorder %v619_v50, 0 }
  0xfc   :  { %824 = vmatpush3.bf16.msra.mxu1 %v821_v51 }
  0xff   :  { %763 = vmatmul.mubr.f32.vlgmr.msra.gmra.mrb[0].mxu1 %v351_v52 }
 0x100   :  { %765 = vmatprep.mubr.f32.mxu1 %v352_v53 }
 0x103   :  { %766 = vmatmul.mubr.f32.gmra.mrb[2].mxu1 %v353_v54 }
 0x104   :  { %768 = vmatprep.mubr.f32.mxu1 %v354_v55 }
 0x107   :  { %769 = vmatmul.mubr.f32.gmra.mrb[4].mxu1 %v355_v56 }
 0x108   :  { %771 = vmatprep.mubr.f32.mxu1 %v356_v57 }
 0x10b   :  { %772 = vmatmul.mubr.f32.gmra.mrb[6].mxu1 %v357_v58 }
 0x1d2   :  { %v764_v0 = vpop.f32.mrb[0].mxu1 }
 0x1d3   :  { %v478_v2 = vadd.f32 %v764_v0, %v374_v61  ;;  %v472_v3 = vpop.f32.mrb[1].mxu1 }
 0x1d4   :  { %v473_v4 = vadd.f32 %v472_v3, %v369_v62 }
 0x1d5   :  { %v512_v5 = vmax.f32 %v478_v2, 0.0 }
 0x1d6   :  { %v511_v6 = vmax.f32 %v473_v4, 0.0  ;;  %v767_v7 = vpop.f32.mrb[2].mxu1 }
 0x1d7   :  { %v488_v8 = vadd.f32 %v767_v7, %v384_v63  ;;  %v482_v9 = vpop.f32.mrb[3].mxu1 }
 0x1d8   :  { %v826_v11 = vpack.c.bf16 %v512_v5, %v511_v6  ;;  %v483_v12 = vadd.f32 %v482_v9, %v379_v1 }
 0x1d9   :  { %v514_v14 = vmax.f32 %v488_v8, 0.0 }
 0x1da   :  { %v513_v15 = vmax.f32 %v483_v12, 0.0  ;;  %v770_v16 = vpop.f32.mrb[4].mxu1  ;;  %827 = vmatpush3.bf16.msra.mxu0 %v826_v11 }
 0x1db   :  { %v498_v17 = vadd.f32 %v770_v16, %v394_v10  ;;  %v492_v18 = vpop.f32.mrb[5].mxu1  ;;  %828 = vmatprep.subr.bf16.mxu0 %v875_v59 }
 0x1dc   :  { %v829_v19 = vpack.c.bf16 %v514_v14, %v513_v15  ;;  %v493_v20 = vadd.f32 %v492_v18, %v389_v13 }
 0x1dd   :  { %v516_v21 = vmax.f32 %v498_v17, 0.0 }
 0x1de   :  { %v515_v23 = vmax.f32 %v493_v20, 0.0  ;;  %v773_v24 = vpop.f32.mrb[6].mxu1  ;;  %830 = vmatpush3.bf16.msra.mxu0 %v829_v19 }
 0x1df   :  { %v508_v26 = vadd.f32 %v773_v24, %v404_v22  ;;  %v502_v27 = vpop.f32.mrb[7].mxu1  ;;  %831 = vmatprep.subr.bf16.mxu0 %v875_v59 }
 0x1e0   :  { %v832_v28 = vpack.c.bf16 %v516_v21, %v515_v23  ;;  %v503_v29 = vadd.f32 %v502_v27, %v399_v25 }
 0x1e1   :  { %v518_v30 = vmax.f32 %v508_v26, 0.0 }
 0x1e2   :  { %v517_v31 = vmax.f32 %v503_v29, 0.0  ;;  %833 = vmatpush3.bf16.msra.mxu0 %v832_v28 }
 0x1e3   :  { %834 = vmatprep.subr.bf16.mxu0 %v875_v59 }
 0x1e4   :  { %v835_v32 = vpack.c.bf16 %v518_v30, %v517_v31 }
 0x1e6   :  { %836 = vmatpush3.bf16.msra.mxu0 %v835_v32 }
 0x1e9   :  { %791 = vmatmul.mubr.msk.f32.vlgmr.msra.gmra.mrb[16].mxu0 %vm526_vm2, %v519_v33 }
 0x2bc   :  { %v596_v35 = vpop.f32.mrb[16].mxu0 }
 0x2bd   :  { %v597_v36 = vadd.f32 %v596_v35, %v524_v34  ;;  %v792_v37 = vpop.f32.mrb[17].mxu0 }
 0x2bf   :  { %v603_v38 = vand.u32 2147483647, %v597_v36  ;;  %v602_v51 = vmax.f32 %v597_v36, 0.0 }
 0x2c1   :  { %v604_v39 = vsub.f32 0.0, %v603_v38 }
 0x2c3   :  { %v605_v40 = vmul.f32 1.442695, %v604_v39 }
 0x2c5   :  { %844 = vpow2.f32 %v605_v40 }
 0x2cf   :  { %v845_v41 = vpop.eup %844 }
 0x2d0   :  { %v607_v42 = vadd.f32 1.0, %v845_v41  ;;  %v610_v43 = vmul.f32 -0.5, %v845_v41  ;;  %v613_v46 = vand.u32 2147483647, %v845_v41 }
 0x2d2   :  { %846 = vlog2.f32 %v607_v42  ;;  %v611_v44 = vadd.f32 1.0, %v610_v43  ;;  %vm614_vm3 = vcmp.lt.f32.partialorder %v613_v46, 0.0004427343 }
 0x2d3   :  { %848 = vtanh.f32 %v597_v36 }
 0x2d4   :  { %v612_v49 = vmul.f32 %v845_v41, %v611_v44 }
 0x2dc   :  { %v847_v47 = vpop.eup %846 }
 0x2dd   :  { %v609_v48 = vmul.f32 0.6931472, %v847_v47  ;;  %v849_v52 = vpop.eup %848 }
 0x2de   :  { %v601_v55 = vmul.f32 3.0, %v849_v52 }
 0x2df   :  { %v615_v53 = vsel %vm614_vm3, %v612_v49, %v609_v48 }
 0x2e0   :  { %v616_v54 = vadd.f32 %v615_v53, %v602_v51 }
 0x2e2   :  { %v617_v56 = vadd.f32 1e-10, %v616_v54 }
 0x2e4   :  { %v621_v57 = vsel %vm620_vm4, %v601_v55, %v617_v56 }
 0x2e5   :  { %622 = vst [vmem:[#allocation2] sm:$0x3] %v621_v57 }
 0x2e6   :  { %861 = shalt.err (!%p858_p4)
}
 0x2e7   :  { %s862_s27 = scalar_lea.hbm %s1107_s7, 32 }
 0x2e8   :  { %p863_p5 = scmp.ne.s32.totalorder %s1107_s7, %s862_s27  ;;  %p866_p6 = scmp.lt.u32.totalorder %s862_s27, %s1107_s7 }
 0x2ea   :  { %p868_p7 = pnand %p866_p6, %p863_p5 }
 0x2ec   :  { %871 = shalt.err (!%p868_p7)
}
 0x2ed   :  { %632 = dma.vmem_to_hbm [thread:$0]  %s630_s24, 32, %s1107_s7, [#allocation3]  }
 0x2ee   :  { %872 = dma.done.wait [#allocation3], 32  }
 0x2ef   :  { %873 = vsyncadd [#allocation3], 4294967264 }
 0x2f0   :  { %636 = vsyncpa [#allocation3], 1 }

</bundles_post_ra>
